<compile_context>
chip_gen: v6e
topology: v6e:2x2x1
jax: 0.10.0
libtpu: 0.0.40
codegen_flags: <defaults>
</compile_context>

<pallas_src>
import functools

import jax
import jax.numpy as jnp
from jax.experimental import pallas as pl
from jax.experimental.pallas import tpu as pltpu

LANE = 128
# Rows of 128 lanes processed per grid step (TI * tile_rows). 4096 rows of f32
# input = 8 MiB of HBM data per step (vector 6 MiB + density 2 MiB).
MAX_STEP_ROWS = 4096
VMEM_LIMIT_BYTES = 48 * 1024 * 1024   # < 64 MiB physical VMEM on v7x


def _sublane_multiple(*dtypes):
    """Block sublane multiple required by the narrowest input dtype."""
    m = 8
    for dt in dtypes:
        item = jnp.dtype(dt).itemsize
        m = max(m, {4: 8, 2: 16, 1: 32}.get(item, 8))
    return m


def _largest_divisor_leq(n, cap):
    cap = max(1, min(cap, n))
    for d in range(cap, 0, -1):
        if n % d == 0:
            return d
    return 1


def _sparsity_kernel(v_ref, d_ref, out_ref, acc_ref, *, tile_rows, rows_total,
                     mask_rows, group_sublanes):
    j = pl.program_id(1)
    last_j = pl.num_programs(1) - 1

    # Per-i(-block) accumulator: re-zeroed at the start of every j sweep so the
    # i axis is independent (safe for "parallel" / megacore sharding).
    @pl.when(j == 0)
    def _():
        acc_ref[...] = jnp.zeros_like(acc_ref)

    v = v_ref[...].astype(jnp.float32)      # (TI, 3, tile_rows, 128)
    d = d_ref[...].astype(jnp.float32)      # (TI, tile_rows, 128)

    # sum_c v_c^2: reduction over a leading (non lane/sublane) axis -> pure VPU adds.
    vsq = jnp.sum(v * v, axis=1)            # (TI, tile_rows, 128)
    term = vsq * (d * d)                    # (TI, tile_rows, 128)

    def _accumulate(t):
        if group_sublanes:
            # Layout-preserving sublane-group split, then leading-axis reduces:
            # (TI, tile_rows, 128) -> (TI, tile_rows//8, 8, 128) -> (8, 128).
            red = t.reshape(t.shape[0], tile_rows // 8, 8, LANE)
            red = red.sum(axis=0).sum(axis=0)
        else:
            red = t.sum(axis=0)             # tiny/ragged tile: (tile_rows, 128)
        acc_ref[...] += red

    if mask_rows:
        # Only the final j tile can run past the logical row count; gate the
        # iota/compare/select to that tile so every other step stays mask-free.
        @pl.when(j != last_j)
        def _():
            _accumulate(term)

        @pl.when(j == last_j)
        def _():
            row = jax.lax.broadcasted_iota(jnp.int32, term.shape, 1)
            _accumulate(jnp.where(j * tile_rows + row < rows_total, term, 0.0))
    else:
        _accumulate(term)

    @pl.when(j == last_j)
    def _():
        out_ref[0] = acc_ref[...]           # per-i partial, summed in the wrapper


def sparsity_loss(vector, density, *, max_step_rows=MAX_STEP_ROWS):
    """Pallas implementation of SparsityLoss.forward (scalar f32 result)."""
    N, S, C, W, H = vector.shape
    assert S == 2 and C == 3, (S, C)
    assert density.shape == (N, S, W, H), density.shape

    NS = N * S
    WH = W * H

    # Lane-dense layout: reshape only (no transpose, no dtype cast in the wrapper);
    # inputs stream in their native dtype, the f32 cast happens in-kernel.
    WH_pad = pl.cdiv(WH, LANE) * LANE
    v = vector.reshape(NS, C, WH)
    d = density.reshape(NS, WH)
    if WH_pad != WH:
        # TODO(synk): rare fallback (WH not a multiple of 128) materializes a padded
        # HBM copy; zero padding is exact (padded terms contribute 0 to every sum).
        v = jnp.pad(v, ((0, 0), (0, 0), (0, WH_pad - WH)))
        d = jnp.pad(d, ((0, 0), (0, WH_pad - WH)))
    R = WH_pad // LANE
    v = v.reshape(NS, C, R, LANE)
    d = d.reshape(NS, R, LANE)

    # Row tile along the spatial axis (dtype-correct sublane multiple).
    sub = _sublane_multiple(vector.dtype, density.dtype)
    if R <= max_step_rows:
        tile_rows = R                                   # full dim -> always legal
    else:
        tile_rows = max(sub, (max_step_rows // sub) * sub)
    n_j = pl.cdiv(R, tile_rows)
    mask_rows = (R % tile_rows) != 0

    # Block TI (n, s) slices per grid step to amortize per-step pipeline overhead,
    # but keep >= 2 i-blocks when possible so the "parallel" axis can be sharded
    # across v7x's two TensorCores.
    ti_cap = max(1, max_step_rows // tile_rows)
    if NS >= 2:
        ti_cap = min(ti_cap, max(1, NS // 2))
    TI = _largest_divisor_leq(NS, ti_cap)
    n_i = NS // TI

    group_sublanes = (tile_rows % 8 == 0)
    acc_rows = 8 if group_sublanes else tile_rows

    kernel = functools.partial(
        _sparsity_kernel, tile_rows=tile_rows, rows_total=R,
        mask_rows=mask_rows, group_sublanes=group_sublanes)

    partials = pl.pallas_call(
        kernel,
        out_shape=jax.ShapeDtypeStruct((n_i, acc_rows, LANE), jnp.float32),
        grid_spec=pltpu.PrefetchScalarGridSpec(
            num_scalar_prefetch=0,
            grid=(n_i, n_j),
            in_specs=[
                pl.BlockSpec((TI, C, tile_rows, LANE), lambda i, j: (i, 0, j, 0)),
                pl.BlockSpec((TI, tile_rows, LANE), lambda i, j: (i, j, 0)),
            ],
            out_specs=pl.BlockSpec((1, acc_rows, LANE), lambda i, j: (i, 0, 0)),
            scratch_shapes=[pltpu.VMEM((acc_rows, LANE), jnp.float32)],
        ),
        compiler_params=pltpu.CompilerParams(
            dimension_semantics=("parallel", "arbitrary"),
            vmem_limit_bytes=VMEM_LIMIT_BYTES),
    )(v, d)

    # mean over (N, W, H); padded / masked elements contributed exactly 0.
    return jnp.sum(partials) * (1.0 / float(N * WH))


def sparsity_loss_ref(vector, density):
    """Pure-JAX reference matching the PyTorch module."""
    v = vector.astype(jnp.float32)
    d = density.astype(jnp.float32)[:, :, None, :, :]     # (N, 2, 1, W, H)
    s = jnp.sum((v * d) ** 2, axis=2)                      # norm(..., dim=1)**2
    penalty = s[:, 0] + s[:, 1]                            # (N, W, H)
    return jnp.mean(penalty)


if __name__ == "__main__":
    key = jax.random.PRNGKey(0)

    def check(N, W, H, **kw):
        k1, k2 = jax.random.split(jax.random.fold_in(key, W * 1000 + H))
        vector = jax.random.normal(k1, (N, 2, 3, W, H), dtype=jnp.float32)
        density = jax.random.uniform(k2, (N, 2, W, H), dtype=jnp.float32)
        loss = jax.block_until_ready(sparsity_loss(vector, density, **kw))
        ref = sparsity_loss_ref(vector, density)
        assert jnp.allclose(loss, ref, atol=1e-5, rtol=1e-4), (N, W, H, loss, ref)

    # Small shapes consistent with the module: (N, 2, 3, W, H) / (N, 2, W, H).
    check(2, 16, 16)                      # tiny: single step, TI=2, small-acc fallback
    check(2, 128, 128)                    # grouped (8,128) accumulator main path
    check(2, 36, 36, max_step_rows=8)     # WH%128!=0 pad + multi-j + row masking

    print("KERNEL_OK")
</pallas_src>

<mosaic_0001>
module attributes {stable_mosaic.version = 11 : i64} {
  func.func @_sparsity_kernel(%arg0: i32, %arg1: i32, %arg2: memref<2x3x2x128xf32, #tpu.memory_space<vmem>>, %arg3: memref<2x2x128xf32, #tpu.memory_space<vmem>>, %arg4: memref<1x2x128xf32, #tpu.memory_space<vmem>>, %arg5: memref<2x128xf32, #tpu.memory_space<vmem>>) attributes {dimension_semantics = [#tpu.dimension_semantics<parallel>, #tpu.dimension_semantics<arbitrary>], iteration_bounds = array<i64: 2, 1>, scalar_prefetch = 0 : i64, scratch_operands = 1 : i64, tpu.core_type = #tpu.core_type<tc>, window_params = [{transform_indices = @transform_0, window_bounds = array<i64: 2, 3, 2, 128>}, {transform_indices = @transform_1, window_bounds = array<i64: 2, 2, 128>}, {transform_indices = @transform_2, window_bounds = array<i64: 1, 2, 128>}]} {
    %c0_i32 = arith.constant 0 : i32
    %0 = arith.cmpi eq, %arg1, %c0_i32 : i32
    %1 = arith.extui %0 : i1 to i32
    %c0_i32_0 = arith.constant 0 : i32
    %2 = arith.cmpi ne, %1, %c0_i32_0 : i32
    scf.if %2 {
      %cst_14 = arith.constant 0.000000e+00 : f32
      %16 = vector.broadcast %cst_14 : f32 to vector<2x128xf32>
      %c0_15 = arith.constant 0 : index
      %c0_16 = arith.constant 0 : index
      %17 = vector.load %arg5[%c0_15, %c0_16] : memref<2x128xf32, #tpu.memory_space<vmem>>, vector<2x128xf32>
      tpu.vector_store %arg5[%c0_15, %c0_16], %16 {strides = array<i32>} : memref<2x128xf32, #tpu.memory_space<vmem>>, vector<2x128xf32>,
    } else {
    }
    %c0 = arith.constant 0 : index
    %c0_1 = arith.constant 0 : index
    %c0_2 = arith.constant 0 : index
    %c0_3 = arith.constant 0 : index
    %3 = vector.load %arg2[%c0, %c0_1, %c0_2, %c0_3] : memref<2x3x2x128xf32, #tpu.memory_space<vmem>>, vector<2x3x2x128xf32>
    %c0_4 = arith.constant 0 : index
    %c0_5 = arith.constant 0 : index
    %c0_6 = arith.constant 0 : index
    %4 = vector.load %arg3[%c0_4, %c0_5, %c0_6] : memref<2x2x128xf32, #tpu.memory_space<vmem>>, vector<2x2x128xf32>
    %5 = arith.mulf %3, %3 : vector<2x3x2x128xf32>
    %cst = arith.constant dense<0.000000e+00> : vector<2x2x128xf32>
    %6 = vector.multi_reduction <add>, %5, %cst [1] : vector<2x3x2x128xf32> to vector<2x2x128xf32>
    %7 = arith.mulf %4, %4 : vector<2x2x128xf32>
    %8 = arith.mulf %6, %7 : vector<2x2x128xf32>
    %cst_7 = arith.constant dense<0.000000e+00> : vector<2x128xf32>
    %9 = vector.multi_reduction <add>, %8, %cst_7 [0] : vector<2x2x128xf32> to vector<2x128xf32>
    %c0_8 = arith.constant 0 : index
    %c0_9 = arith.constant 0 : index
    %10 = vector.load %arg5[%c0_8, %c0_9] : memref<2x128xf32, #tpu.memory_space<vmem>>, vector<2x128xf32>
    %11 = arith.addf %10, %9 : vector<2x128xf32>
    %c0_10 = arith.constant 0 : index
    %c0_11 = arith.constant 0 : index
    %12 = vector.load %arg5[%c0_10, %c0_11] : memref<2x128xf32, #tpu.memory_space<vmem>>, vector<2x128xf32>
    tpu.vector_store %arg5[%c0_10, %c0_11], %11 {strides = array<i32>} : memref<2x128xf32, #tpu.memory_space<vmem>>, vector<2x128xf32>,
    %c0_i32_12 = arith.constant 0 : i32
    %13 = arith.cmpi eq, %arg1, %c0_i32_12 : i32
    %14 = arith.extui %13 : i1 to i32
    %c0_i32_13 = arith.constant 0 : i32
    %15 = arith.cmpi ne, %14, %c0_i32_13 : i32
    scf.if %15 {
      %c0_14 = arith.constant 0 : index
      %c0_15 = arith.constant 0 : index
      %16 = vector.load %arg5[%c0_14, %c0_15] : memref<2x128xf32, #tpu.memory_space<vmem>>, vector<2x128xf32>
      %c0_16 = arith.constant 0 : index
      %c0_17 = arith.constant 0 : index
      %c0_18 = arith.constant 0 : index
      %17 = vector.load %arg4[%c0_16, %c0_17, %c0_18] : memref<1x2x128xf32, #tpu.memory_space<vmem>>, vector<1x2x128xf32>
      %18 = vector.shape_cast %17 : vector<1x2x128xf32> to vector<2x128xf32>
      %19 = vector.shape_cast %16 : vector<2x128xf32> to vector<1x2x128xf32>
      tpu.vector_store %arg4[%c0_16, %c0_17, %c0_18], %19 {strides = array<i32>} : memref<1x2x128xf32, #tpu.memory_space<vmem>>, vector<1x2x128xf32>,
    } else {
    }
    return
  }
  func.func @transform_0(%arg0: i32, %arg1: i32) -> (i32, i32, i32, i32) {
    %c0_i32 = arith.constant 0 : i32
    %c0_i32_0 = arith.constant 0 : i32
    %c0_i32_1 = arith.constant 0 : i32
    return %arg0, %c0_i32, %arg1, %c0_i32_0 : i32, i32, i32, i32
  }
  func.func @transform_1(%arg0: i32, %arg1: i32) -> (i32, i32, i32) {
    %c0_i32 = arith.constant 0 : i32
    %c0_i32_0 = arith.constant 0 : i32
    return %arg0, %arg1, %c0_i32 : i32, i32, i32
  }
  func.func @transform_2(%arg0: i32, %arg1: i32) -> (i32, i32, i32) {
    %c0_i32 = arith.constant 0 : i32
    %c0_i32_0 = arith.constant 0 : i32
    %c0_i32_1 = arith.constant 0 : i32
    return %arg0, %c0_i32, %c0_i32_0 : i32, i32, i32
  }
}

</mosaic_0001>

<bundles_post_ra>
// kernel: tpu_custom_call.1
= control target key start
LH: loop header
LB: loop body
LE: loop exit
PB: predicated region body
PF: predicated region fallthrough
CT: control target
= control target key end

     0   :  { %7 = vsyncpa [#allocation4], 0  ;;  %s818_s0 = inlined_call_operand.hbm [shape: f32[4,3,2,128], index: 0, kind: input, shape index: {}]   ;;  %s819_s1 = inlined_call_operand.hbm [shape: f32[4,2,128], index: 1, kind: input, shape index: {}]   ;;  %s820_s2 = inlined_call_operand.hbm [shape: f32[2,2,128], index: 2, kind: output, shape index: {}]  }
   0x1   :  { %9 = vsyncpa [#allocation4 + $0x1], 0 }
   0x2   :  { %10 = vsyncpa [#allocation7], 0 }
   0x3   :  { %12 = vsyncpa [#allocation7 + $0x1], 0 }
   0x4   :  { %13 = vsyncpa [#allocation5], 0 }
   0x5   :  { %15 = vsyncpa [#allocation5 + $0x1], 0  ;;  %s641_s9 = smov 0   ;;  %s643_s10 = smov 0  }
   0x6   :  { %s645_s11 = smov 0   ;;  %s647_s12 = smov 0  }
   0x7   :  { %s649_s13 = smov 0   ;;  %s651_s14 = smov 0  }
   0x8 LB: > { %s387_s15 = sadd.s32 4294967295, %s618_s14   ;;  %s388_s16 = sadd.s32 4294967294, %s618_s14   ;;  %s618_s14 = sphi %s651_s14, %s21_s14   ;;  %s614_s13 = sphi %s649_s13, %s832_s13   ;;  %s610_s12 = sphi %s647_s12, %s831_s12   ;;  %s606_s11 = sphi %s645_s11, %s830_s11   ;;  %s602_s10 = sphi %s643_s10, %s829_s10   ;;  %s598_s9 = sphi %s641_s9, %s828_s9  }
   0x9   : > { %s33_s17 = sadd.s32 1, %s614_s13  ;;  %s42_s18 = sadd.s32 1, %s606_s11 }
   0xa   : > { %p35_p0 = scmp.ge.s32.totalorder %s33_s17, 2  ;;  %p49_p1 = scmp.ne.s32.totalorder %s606_s11, %s602_s10 }
   0xb   : > { %p50_p2 = scmp.eq.s32.totalorder %s618_s14, 0  ;;  %p55_p3 = scmp.ne.s32.totalorder %s602_s10, %s598_s9 }
   0xc   : > { %s834_s17 = smov (%p35_p0, %s33_s17), 0  ;;  %p56_p5 = scmp.eq.s32.totalorder %s387_s15, 0 }
   0xd   : > { %p682_p4 = por %p50_p2, %p49_p1  ;;  %s37_s20 = ssub.s32 %s614_s13, %s834_s17 }
   0xe   : > { %p107_p6 = scmp.eq.s32.totalorder %s387_s15, 1  ;;  %p40_p7 = scmp.eq.s32.totalorder %s37_s20, 0 }
   0xf   : > { %p688_p8 = por %p56_p5, %p55_p3  ;;  %p113_p10 = scmp.eq.s32.totalorder %s388_s16, 1 }
  0x10   : > { %p692_p9 = por %p107_p6, %p49_p1  ;;  %p425_p13 = scmp.lt.s32.totalorder %s618_s14, 2 }
  0x11   : > { %s697_s23 = scalar_select %p40_p7, %s606_s11, %s42_s18  }
  0x12   : > { %p699_p11 = por %p113_p10, %p55_p3  ;;  %s706_s25 = sand.u32 1, %s606_s11  }
  0x13   : > { %s405_s26 = smul.u32 12, %s706_s25  ;;  %p712_p0 = pnand %p425_p13, %p682_p4 }
  0x14   : > { %s406_s27 = smul.u32 192, %s614_s13  ;;  %p397_p1 = scmp.ge.s32.totalorder %s618_s14, 1 }
  0x15   : > { %s137_s4 = scalar_lea.vmem [#allocation3], %s405_s26  ;;  %s134_s6 = scalar_lea.sflag [#allocation4], %s706_s25 }
  0x16   : > { %s145_s3 = scalar_lea.hbm %s818_s0, %s406_s27  ;;  %s146_s5 = sshll.u32 %s137_s4, 4  ;;  %s147_s5 = int_to_ptr.vmem [resolvable:$true] %s146_s5 }
  0x17   : > { %p480_p2 = pneg %p712_p0  ;;  %s491_s7 = scalar_lea.vmem %s147_s5, 192 }
  0x18   : > { %p492_p3 = scmp.ne.s32.totalorder %s147_s5, %s491_s7  ;;  %s620_s8 = smov [#allocation3]  }
  0x19   : > { %s496_s15 = sshll.u32 %s620_s8, 4  ;;  %s497_s15 = int_to_ptr.vmem [resolvable:$false] %s496_s15 }
  0x1a   : > { %p494_p4 = pnand %p492_p3, %p480_p2  ;;  %s498_s16 = scalar_lea.vmem %s497_s15, 384 }
  0x1b   : > { %p499_p6 = scmp.lt.s32.totalorder %s147_s5, %s497_s15  ;;  %p500_p7 = scmp.lt.s32.totalorder %s498_s16, %s491_s7 }
  0x1c   : > { %p495_p5 = pneg %p494_p4 }
  0x1d   : > { %p501_p10 = por %p500_p7, %p499_p6 }
  0x1f   : > { %p502_p13 = pnand %p501_p10, %p495_p5 }
  0x21   : > { %505 = shalt.err (!%p502_p13)
}
  0x22   : > { %s621_s18 = smov 32   ;;  %s622_s19 = smov 2  }
  0x23   : > { %417 = dma.hbm_to_vmem [thread:$0]  (!%p712_p0), %s145_s3, 192, %s147_s5, %s134_s6, %s621_s18, %s621_s18, %s622_s19  }
  0x24   : > { %p176_p3 = scmp.lt.s32.totalorder %s618_s14, 3  ;;  %s394_s20 = sshll.u32 %s706_s25, 2 }
  0x25   : > { %s404_s26 = sshll.u32 %s614_s13, 6  ;;  %s160_s7 = scalar_lea.vmem [#allocation6], %s394_s20 }
  0x26   : > { %p733_p4 = pnand %p397_p1, %p176_p3  ;;  %s167_s4 = scalar_lea.hbm %s819_s1, %s404_s26 }
  0x27   : > { %s168_s8 = sshll.u32 %s160_s7, 4  ;;  %s157_s15 = scalar_lea.sflag [#allocation7], %s706_s25  ;;  %s169_s8 = int_to_ptr.vmem [resolvable:$true] %s168_s8 }
  0x28   : > { %s519_s16 = scalar_lea.vmem %s169_s8, 64  ;;  %s623_s3 = smov [#allocation6]  }
  0x29   : > { %p520_p5 = scmp.ne.s32.totalorder %s169_s8, %s519_s16  ;;  %s524_s5 = sshll.u32 %s623_s3, 4  ;;  %s525_s5 = int_to_ptr.vmem [resolvable:$false] %s524_s5 }
  0x2a   : > { %s526_s6 = scalar_lea.vmem %s525_s5, 128  ;;  %p527_p1 = scmp.lt.s32.totalorder %s169_s8, %s525_s5 }
  0x2b   : > { %p522_p6 = pnand %p520_p5, %p480_p2  ;;  %p528_p10 = scmp.lt.s32.totalorder %s526_s6, %s519_s16 }
  0x2d   : > { %p523_p7 = pneg %p522_p6  ;;  %p529_p13 = por %p528_p10, %p527_p1 }
  0x2f   : > { %p530_p3 = pnand %p529_p13, %p523_p7 }
  0x31   : > { %533 = shalt.err (!%p530_p3)
}
  0x32   : > { %420 = dma.hbm_to_vmem [thread:$0]  (!%p712_p0), %s167_s4, 64, %s169_s8, %s157_s15, %s621_s18, %s621_s18, %s622_s19  }
  0x33   : > { %180 = sbr.rel (%p733_p4) target bundleno = 98 (0x62), region = 28  ;;  %s749_s25 = sand.u32 (!%p733_p4), 1, %s602_s10  }
  0x34   : > { %s407_s20 = smul.u32 (!%p733_p4), 12, %s749_s25  ;;  %s183_s26 = scalar_lea.sflag (!%p733_p4), [#allocation4], %s749_s25 }
  0x36   : > { %s186_s29 = scalar_lea.vmem (!%p733_p4), [#allocation3], %s407_s20 }
  0x38   : > { %585 = dma.done.wait (%p688_p8), %s183_s26, 192  }
  0x39   : > { %587 = vsyncadd (%p688_p8), %s183_s26, 4294967104  ;;  %s398_s28 = sshll.u32 %s749_s25, 2  ;;  %s192_s18 = scalar_lea.sflag [#allocation7], %s749_s25 }
  0x3a   : > { %s195_s19 = scalar_lea.vmem [#allocation6], %s398_s28 }
  0x3b   : > { %589 = dma.done.wait (%p688_p8), %s192_s18, 64  }
  0x3c   : > { %591 = vsyncadd (%p688_p8), %s192_s18, 4294967232  ;;  %v624_v0 = vmov 0.0   ;;  %vm242_vm0 = vcmask 1041408   ;;  %v228_v1 = vld [vmem:[%s186_s29] sm:$0x3]  ;;  %s399_s21 = sshll.u32 %s749_s25, 1 }
  0x3d   : > { %227 = vst [vmem:[#allocation2] sm:$0x3] %v624_v0  ;;  %v229_v2 = vld [vmem:[%s186_s29 + $0x2] sm:$0x3]  ;;  %v230_v3 = vld [vmem:[%s186_s29 + $0x4] sm:$0x3]  ;;  %v236_v7 = vmul.f32 %v228_v1, %v228_v1 }
  0x3e   : > { %v231_v4 = vld [vmem:[%s186_s29 + $0x6] sm:$0x3]  ;;  %v232_v5 = vld [vmem:[%s186_s29 + $0x8] sm:$0x3]  ;;  %v233_v6 = vld [vmem:[%s186_s29 + $0xa] sm:$0x3]  ;;  %v237_v8 = vmul.f32 %v229_v2, %v229_v2  ;;  %v238_v9 = vmul.f32 %v230_v3, %v230_v3 }
  0x3f   : > { %v234_v10 = vld [vmem:[%s195_s19] sm:$0x3]  ;;  %v235_v11 = vld [vmem:[%s195_s19 + $0x2] sm:$0x3]  ;;  %v239_v12 = vmul.f32 %v231_v4, %v231_v4  ;;  %v240_v13 = vmul.f32 %v232_v5, %v232_v5  ;;  %v241_v14 = vmul.f32 %v233_v6, %v233_v6  ;;  %v243_v15 = vsel %vm242_vm0, %v236_v7, 0.0  ;;  %s220_s27 = scalar_lea.vmem [#allocation8], %s399_s21 }
  0x40   : > { %v244_v16 = vsel %vm242_vm0, %v237_v8, 0.0  ;;  %v246_v17 = vsel %vm242_vm0, %v238_v9, 0.0  ;;  %v253_v18 = vmul.f32 %v234_v10, %v234_v10  ;;  %v254_v24 = vmul.f32 %v235_v11, %v235_v11  ;;  %s282_s30 = sshll.u32 %s220_s27, 4  ;;  %s401_s4 = sshll.u32 %s610_s12, 5  ;;  %s773_s30 = int_to_ptr.vmem [resolvable:$true] %s282_s30 }
  0x41   : > { %v245_v19 = vadd.f32 %v244_v16, %v243_v15  ;;  %v248_v20 = vsel %vm242_vm0, %v239_v12, 0.0  ;;  %v249_v21 = vsel %vm242_vm0, %v240_v13, 0.0  ;;  %v251_v22 = vsel %vm242_vm0, %v241_v14, 0.0  ;;  %s280_s15 = scalar_lea.hbm %s820_s2, %s401_s4  ;;  %s269_s16 = scalar_lea.sflag [#allocation5], %s749_s25 }
  0x42   : > { %v250_v23 = vadd.f32 %v249_v21, %v248_v20  ;;  %s534_s3 = scalar_lea.vmem %s773_s30, 32  ;;  %s625_s5 = smov [#allocation8]  }
  0x43   : > { %v247_v25 = vadd.f32 %v246_v17, %v245_v19  ;;  %p535_p8 = scmp.ne.s32.totalorder %s773_s30, %s534_s3  ;;  %s538_s6 = sshll.u32 %s625_s5, 4  ;;  %s539_s6 = int_to_ptr.vmem [resolvable:$false] %s538_s6 }
  0x44   : > { %v252_v26 = vadd.f32 %v251_v22, %v250_v23  ;;  %v260_v31 = vld [vmem:[#allocation2] sm:$0x3]  ;;  %s540_s12 = scalar_lea.vmem %s539_s6, 64  ;;  %p541_p4 = scmp.lt.s32.totalorder %s773_s30, %s539_s6 }
  0x45   : > { %v255_v27 = vmul.f32 %v253_v18, %v247_v25  ;;  %p536_p0 = pnand %p535_p8, %p692_p9  ;;  %p542_p5 = scmp.lt.s32.totalorder %s540_s12, %s534_s3 }
  0x46   : > { %v256_v28 = vmul.f32 %v254_v24, %v252_v26 }
  0x47   : > { %v257_v29 = vsel %vm242_vm0, %v255_v27, 0.0  ;;  %p537_p2 = pneg %p536_p0  ;;  %p543_p6 = por %p542_p5, %p541_p4 }
  0x48   : > { %v258_v30 = vsel %vm242_vm0, %v256_v28, 0.0 }
  0x49   : > { %v259_v32 = vadd.f32 %v258_v30, %v257_v29  ;;  %p544_p7 = pnand %p543_p6, %p537_p2 }
  0x4b   : > { %v261_v33 = vadd.f32 %v260_v31, %v259_v32 }
  0x4d   : > { %262 = vst [vmem:[#allocation2] sm:$0x3] %v261_v33 }
  0x54   : > { %v266_v34 = vld [vmem:[#allocation2] sm:$0x3] }
  0x55   : > { %267 = vst [vmem:[%s220_s27] sm:$0x3] %v266_v34 }
  0x56   : > { %547 = shalt.err (!%p544_p7)
}
  0x57   : > { %s548_s20 = scalar_lea.hbm %s280_s15, 32  ;;  %s552_s29 = scalar_lea.hbm %s820_s2, 64 }
  0x58   : > { %p549_p1 = scmp.ne.s32.totalorder %s280_s15, %s548_s20  ;;  %p553_p3 = scmp.lt.s32.totalorder %s280_s15, %s820_s2 }
  0x59   : > { %p554_p8 = scmp.lt.s32.totalorder %s552_s29, %s548_s20 }
  0x5a   : > { %p550_p10 = pnand %p549_p1, %p692_p9 }
  0x5b   : > { %p555_p0 = por %p554_p8, %p553_p3 }
  0x5c   : > { %p551_p13 = pneg %p550_p10 }
  0x5e   : > { %p556_p12 = pnand %p555_p0, %p551_p13 }
  0x60   : > { %559 = shalt.err (!%p556_p12)
}
  0x61   : > { %412 = dma.vmem_to_hbm [thread:$0]  (%p692_p9), %s773_s30, 32, %s280_s15, %s269_s16  }
  0x62 PF: > { %s294_s19 = sand.u32 1, %s598_s9   ;;  %p827_p2 = scmp.ge.s32.totalorder %s618_s14, 2 }
  0x63   : > { %s295_s21 = scalar_lea.sflag [#allocation5], %s294_s19 }
  0x64   : > { %p422_p4 = pnand %p827_p2, %p699_p11 }
  0x66   : > { %p423_p5 = pneg %p422_p4 }
  0x68   : > { %593 = dma.done.wait (%p423_p5), %s295_s21, 32  }
  0x69   : > { %595 = vsyncadd (%p423_p5), %s295_s21, 4294967264  ;;  %s21_s14 = sadd.s32 1, %s618_s14   ;;  %s828_s9 = smov %s602_s10 }
  0x6a   : > { %p18_p6 = scmp.ge.s32.totalorder %s21_s14, 4   ;;  %s829_s10 = smov %s606_s11 }
  0x6b   : > { %s830_s11 = smov %s697_s23  ;;  %s831_s12 = smov %s614_s13 }
  0x6c   : > { %s832_s13 = smov %s834_s17  ;;  %20 = sbr.rel (!%p18_p6) target bundleno = 8 (0x8), region = 94 }
  0x71   :  { %300 = vsyncpa [#allocation4], 1 }
  0x72   :  { %302 = vsyncpa [#allocation4 + $0x1], 1 }
  0x73   :  { %303 = vsyncpa [#allocation7], 1 }
  0x74   :  { %305 = vsyncpa [#allocation7 + $0x1], 1 }
  0x75   :  { %306 = vsyncpa [#allocation5], 1 }
  0x76   :  { %308 = vsyncpa [#allocation5 + $0x1], 1 }

</bundles_post_ra>
